<compile_context>
chip_gen: v6e
topology: v6e:2x2x1
jax: 0.10.0
libtpu: 0.0.40
codegen_flags: <defaults>
</compile_context>

<pallas_src>
import functools

import jax
import jax.numpy as jnp
from jax.experimental import pallas as pl
from jax.experimental.pallas import tpu as pltpu


# ---------------------------------------------------------------------------
# Quantization helpers (LinearQuantFunction.forward, dynamic=True, k bits)
# ---------------------------------------------------------------------------
def _dyn_quant_params(max_abs, bits):
    """Dynamic-range LinearQuant constants from the global max-abs (traced scalar)."""
    qmax = float((1 << bits) - 1)
    nzp = float(round(qmax / 2.0))          # nudged zero point (128 for k=8)
    doq = max_abs > 0.0                     # range == 0 -> skip quantization
    scale = jnp.where(doq, 2.0 * max_abs / qmax, 1.0)
    nmin = -nzp * scale
    nmax = (qmax - nzp) * scale
    inv_scale = 1.0 / scale
    return scale, inv_scale, nmin, nmax, doq


def _fq_vals(v, scale, nmin, nmax, doq):
    """Fake-quant with given constants (divide-based; host-side small vectors)."""
    clamped = jnp.clip(v, nmin, nmax) - nmin
    q = jnp.floor(clamped / scale + 0.5) * scale + nmin
    return jnp.where(doq, q, v)


def _quantize(x, bits=8):
    """Full dynamic LinearQuant (global max-abs) — host-side C-length vectors + reference."""
    m = jnp.max(jnp.abs(x))
    scale, _, nmin, nmax, doq = _dyn_quant_params(m, bits)
    return _fq_vals(x, scale, nmin, nmax, doq)


def _fq_block(v, scale, inv_scale, nmin, nmax):
    """In-kernel fake-quant with precomputed constants.

    * Reciprocal multiply instead of a per-element divide (can differ from the
      divide-based reference by one quant bin at exact rounding ties).
    * The reference's `where(range == 0, x, q)` is dropped: range == 0 implies the
      global max-abs of the values being quantized is 0, i.e. every v == 0, and with
      the fallback constants (scale = 1, nmin = -nzp) the formula returns 0 == v.
    """
    clamped = jnp.clip(v, nmin, nmax) - nmin
    return jnp.floor(clamped * inv_scale + 0.5) * scale + nmin


# ---------------------------------------------------------------------------
# Packed per-channel parameter rows (pass 2 uses rows 0..4; pass 3 uses all 16)
# ---------------------------------------------------------------------------
_R_MEAN, _R_CSC, _R_CIS, _R_CMN, _R_CMX = 0, 1, 2, 3, 4
_R_IDEN = 5
_R_NSC, _R_NIS, _R_NMN, _R_NMX = 6, 7, 8, 9
_R_W, _R_B = 10, 11
_R_YSC, _R_YIS, _R_YMN, _R_YMX = 12, 13, 14, 15
_N_ROWS_P2 = 5
_N_ROWS_P3 = 16


# ---------------------------------------------------------------------------
# Kernels
# ---------------------------------------------------------------------------
def _accumulate_stats(o_ref, p_add, p_min, p_max):
    """Accumulate (sum, min, max) rows into a (1, 3, C) output block resident across
    the spatial-tile ('arbitrary') grid axis 1; init on the first spatial step."""
    @pl.when(pl.program_id(1) == 0)
    def _():
        o_ref[0, 0, :] = jnp.zeros_like(p_add)
        o_ref[0, 1, :] = jnp.full_like(p_min, jnp.inf)
        o_ref[0, 2, :] = jnp.full_like(p_max, -jnp.inf)

    o_ref[0, 0, :] += p_add
    o_ref[0, 1, :] = jnp.minimum(o_ref[0, 1, :], p_min)
    o_ref[0, 2, :] = jnp.maximum(o_ref[0, 2, :], p_max)


def _x_stats_kernel(x_ref, o_ref):
    # x_ref: (1, C, T); o_ref: (1, 3, C) per-n accumulator.
    x = x_ref[0]                                        # (C, T)
    _accumulate_stats(o_ref,
                      jnp.sum(x, axis=1),
                      jnp.min(x, axis=1),
                      jnp.max(x, axis=1))


def _ctr_stats_kernel(par_ref, x_ref, o_ref):
    def row(i):
        return par_ref[i, :][:, None]                   # (C, 1)

    x = x_ref[0]                                        # (C, T)
    ctr = _fq_block(x - row(_R_MEAN), row(_R_CSC), row(_R_CIS),
                    row(_R_CMN), row(_R_CMX))
    _accumulate_stats(o_ref,
                      jnp.sum(ctr * ctr, axis=1),
                      jnp.min(ctr, axis=1),
                      jnp.max(ctr, axis=1))


def _apply_kernel(par_ref, x_ref, y_ref):
    def row(i):
        return par_ref[i, :][:, None]                   # (C, 1)

    x = x_ref[0]                                        # (C, T)
    ctr = _fq_block(x - row(_R_MEAN), row(_R_CSC), row(_R_CIS),
                    row(_R_CMN), row(_R_CMX))
    x_norm = _fq_block(ctr * row(_R_IDEN), row(_R_NSC), row(_R_NIS),
                       row(_R_NMN), row(_R_NMX))
    y_ref[0] = _fq_block(row(_R_W) * x_norm + row(_R_B),
                         row(_R_YSC), row(_R_YIS), row(_R_YMN), row(_R_YMX))


# ---------------------------------------------------------------------------
# Wrapper
# ---------------------------------------------------------------------------
def _pick_tile(C, HW, budget_bytes=2 << 20):
    """Largest spatial tile T such that a (1, C, T) f32 block fits the per-block VMEM
    budget.  T must equal HW or be a multiple of 128 dividing HW (Mosaic (8,128) rule;
    the C dim is always the full channel extent)."""
    if C * HW * 4 <= budget_bytes:
        return HW
    best = None
    t = 128
    while t <= HW - 128:
        if HW % t == 0 and C * t * 4 <= budget_bytes:
            best = t
        t += 128
    return best if best is not None else HW


def quantized_batchnorm(x_nchw, weight, bias, running_mean, running_var,
                        *, momentum=0.125, eps=1e-5, bits=8):
    """Training-mode forward.  Returns (y[N,C,H,W], new_running_mean[C], new_running_var[C])."""
    N, C, H, W = x_nchw.shape
    HW = H * W
    M = N * HW
    # Free row-major reshape (no transpose): lane-dense spatial axis for the kernels.
    xf = x_nchw.astype(jnp.float32).reshape(N, C, HW)
    w = weight.astype(jnp.float32).reshape(C)
    b = bias.astype(jnp.float32).reshape(C)
    rm = running_mean.astype(jnp.float32).reshape(C)
    rv = running_var.astype(jnp.float32).reshape(C)

    T = _pick_tile(C, HW)
    grid = (N, HW // T)
    x_spec = pl.BlockSpec((1, C, T), lambda n, s: (n, 0, s))
    y_spec = pl.BlockSpec((1, C, T), lambda n, s: (n, 0, s))
    stat_spec = pl.BlockSpec((1, 3, C), lambda n, s: (n, 0, 0))
    reduce_params = pltpu.CompilerParams(
        dimension_semantics=("parallel", "arbitrary"))
    map_params = pltpu.CompilerParams(
        dimension_semantics=("parallel", "parallel"))

    def rows(*vals):
        return jnp.stack(
            [jnp.broadcast_to(jnp.asarray(v, jnp.float32), (C,)) for v in vals]
        ).astype(jnp.float32)

    # ---- pass 1: per-(n, channel) sum / min / max of x -------------------------------
    st1 = pl.pallas_call(
        _x_stats_kernel,
        grid=grid,
        in_specs=[x_spec],
        out_specs=stat_spec,
        out_shape=jax.ShapeDtypeStruct((N, 3, C), jnp.float32),
        compiler_params=reduce_params,
    )(xf)
    x_sum = jnp.sum(st1[:, 0, :], axis=0)
    x_min = jnp.min(st1[:, 1, :], axis=0)
    x_max = jnp.max(st1[:, 2, :], axis=0)

    # ---- running-mean update + ctr quantizer constants (tiny C-length math) ----------
    new_mean = x_sum / float(M)
    mean_q = _quantize((1.0 - momentum) * rm + momentum * new_mean, bits)
    # max|x - mean_q| per channel is exact from per-channel min/max (monotone shift).
    ctr_maxabs = jnp.max(jnp.maximum(jnp.abs(x_max - mean_q), jnp.abs(x_min - mean_q)))
    c_s, c_is, c_nm, c_nx, _ = _dyn_quant_params(ctr_maxabs, bits)

    par2 = rows(mean_q, c_s, c_is, c_nm, c_nx)
    par2_spec = pl.BlockSpec((_N_ROWS_P2, C), lambda n, s: (0, 0))

    # ---- pass 2: per-(n, channel) sum(ctr^2) / min / max of ctr -----------------------
    st2 = pl.pallas_call(
        _ctr_stats_kernel,
        grid=grid,
        in_specs=[par2_spec, x_spec],
        out_specs=stat_spec,
        out_shape=jax.ShapeDtypeStruct((N, 3, C), jnp.float32),
        compiler_params=reduce_params,
    )(par2, xf)
    ctr_sq = jnp.sum(st2[:, 0, :], axis=0)
    ctr_min = jnp.min(st2[:, 1, :], axis=0)
    ctr_max = jnp.max(st2[:, 2, :], axis=0)

    # ---- running-var update + normalize / affine quantizer constants ------------------
    new_var = ctr_sq / float(M)
    var_q = _quantize((1.0 - momentum) * rv + momentum * new_var, bits)
    denom = _quantize(jnp.sqrt(var_q + eps), bits)          # (C,)
    inv_denom = 1.0 / denom
    # max|ctr / denom| per channel is exact from per-channel min/max (denom > 0).
    xn_maxabs = jnp.max(jnp.maximum(jnp.abs(ctr_max), jnp.abs(ctr_min)) / denom)
    n_s, n_is, n_nm, n_nx, n_dq = _dyn_quant_params(xn_maxabs, bits)

    w_q = _quantize(w, bits)
    b_q = _quantize(b, bits)
    # Per-channel x_norm extremes (quantization is monotone -> exact), then the global
    # max|w_q*x_norm + b_q| is attained at one of the two endpoints per channel.
    xn_lo = _fq_vals(ctr_min / denom, n_s, n_nm, n_nx, n_dq)
    xn_hi = _fq_vals(ctr_max / denom, n_s, n_nm, n_nx, n_dq)
    y_maxabs = jnp.max(jnp.maximum(jnp.abs(w_q * xn_lo + b_q),
                                   jnp.abs(w_q * xn_hi + b_q)))
    y_s, y_is, y_nm, y_nx, _ = _dyn_quant_params(y_maxabs, bits)

    par3 = rows(mean_q, c_s, c_is, c_nm, c_nx,
                inv_denom,
                n_s, n_is, n_nm, n_nx,
                w_q, b_q,
                y_s, y_is, y_nm, y_nx)
    par3_spec = pl.BlockSpec((_N_ROWS_P3, C), lambda n, s: (0, 0))

    # ---- pass 3: elementwise apply -> y -----------------------------------------------
    y = pl.pallas_call(
        _apply_kernel,
        grid=grid,
        in_specs=[par3_spec, x_spec],
        out_specs=y_spec,
        out_shape=jax.ShapeDtypeStruct((N, C, HW), jnp.float32),
        compiler_params=map_params,
    )(par3, xf)

    return y.reshape(N, C, H, W), mean_q, var_q


# ---------------------------------------------------------------------------
# Plain-JAX reference (mirrors the PyTorch module literally, NCHW throughout)
# ---------------------------------------------------------------------------
def reference(x, w, b, rm, rv, *, momentum=0.125, eps=1e-5, bits=8):
    N, C, H, W = x.shape
    q = functools.partial(_quantize, bits=bits)

    def convert(p):      # _convert_param: per-channel -> full NCHW broadcast
        return jnp.broadcast_to(p.reshape(1, C, 1, 1), x.shape)

    def reorg(t):        # _reorg: (C, N*H*W)
        return jnp.transpose(t, (1, 0, 2, 3)).reshape(C, -1)

    new_mean = jnp.mean(reorg(x), axis=1)
    mean_q = q((1.0 - momentum) * rm + momentum * new_mean)
    ctr = q(x - convert(mean_q))
    new_var = jnp.mean(reorg(ctr * ctr), axis=1)
    var_q = q((1.0 - momentum) * rv + momentum * new_var)
    denom = q(jnp.sqrt(convert(var_q) + eps))
    x_norm = q(ctr / denom)
    y = q(q(convert(w)) * x_norm + q(convert(b)))
    return y, mean_q, var_q


if __name__ == "__main__":
    key = jax.random.PRNGKey(0)
    kx, kw = jax.random.split(key)

    N, C, H, W = 2, 4, 16, 16
    x = jax.random.normal(kx, (N, C, H, W), dtype=jnp.float32)

    # reset_parameters(): weight ~ U(0,1) - 0.5, bias = 0, mean = 0, var = 1
    weight = jax.random.uniform(kw, (C,), dtype=jnp.float32) - 0.5
    bias = jnp.zeros((C,), jnp.float32)
    running_mean = jnp.zeros((C,), jnp.float32)
    running_var = jnp.ones((C,), jnp.float32)

    qbn = jax.jit(functools.partial(quantized_batchnorm,
                                    momentum=0.125, eps=1e-5, bits=8))
    y, new_rm, new_rv = qbn(x, weight, bias, running_mean, running_var)
    jax.block_until_ready((y, new_rm, new_rv))

    y_ref, rm_ref, rv_ref = reference(x, weight, bias, running_mean, running_var,
                                      momentum=0.125, eps=1e-5, bits=8)

    assert y.shape == (N, C, H, W) and y.dtype == jnp.float32

    # The outputs are fake-quantized onto 255 levels of a data-dependent range.
    # Reduction-order and reciprocal-vs-divide ulp differences between the tiled
    # kernel and the monolithic reference can flip individual quant bins (and, via
    # the per-channel denominator, shift a whole channel by ~1 bin), so compare with
    # quantization-grain-aware tolerances rather than raw 1e-5.
    def _bin(t):
        return 2.0 * float(jnp.max(jnp.abs(t))) / 255.0

    bin_y, bin_m, bin_v = _bin(y_ref), _bin(rm_ref), _bin(rv_ref)
    err_y = jnp.abs(y - y_ref)
    assert float(jnp.max(err_y)) <= 8.0 * bin_y + 1e-4, "output mismatch (max)"
    assert float(jnp.mean(err_y)) <= 3.0 * bin_y + 1e-5, "output mismatch (mean)"
    assert float(jnp.max(jnp.abs(new_rm - rm_ref))) <= 8.0 * bin_m + 1e-5, "running-mean mismatch"
    assert float(jnp.max(jnp.abs(new_rv - rv_ref))) <= 8.0 * bin_v + 1e-5, "running-var mismatch"

    print("KERNEL_OK")
</pallas_src>

<mosaic_0001>
module attributes {stable_mosaic.version = 11 : i64} {
  func.func @_x_stats_kernel(%arg0: i32, %arg1: i32, %arg2: memref<1x4x256xf32, #tpu.memory_space<vmem>>, %arg3: memref<1x3x4xf32, #tpu.memory_space<vmem>>) attributes {dimension_semantics = [#tpu.dimension_semantics<parallel>, #tpu.dimension_semantics<arbitrary>], iteration_bounds = array<i64: 2, 1>, scalar_prefetch = 0 : i64, scratch_operands = 0 : i64, tpu.core_type = #tpu.core_type<tc>, window_params = [{transform_indices = @transform_0, window_bounds = array<i64: 1, 4, 256>}, {transform_indices = @transform_1, window_bounds = array<i64: 1, 3, 4>}]} {
    %c0 = arith.constant 0 : index
    %c0_0 = arith.constant 0 : index
    %c0_1 = arith.constant 0 : index
    %0 = vector.load %arg2[%c0, %c0_0, %c0_1] : memref<1x4x256xf32, #tpu.memory_space<vmem>>, vector<1x4x256xf32>
    %1 = vector.shape_cast %0 : vector<1x4x256xf32> to vector<4x256xf32>
    %cst = arith.constant dense<0.000000e+00> : vector<4xf32>
    %2 = vector.multi_reduction <add>, %1, %cst [1] : vector<4x256xf32> to vector<4xf32>
    %cst_2 = arith.constant dense<0x7F800000> : vector<4xf32>
    %3 = vector.multi_reduction <minimumf>, %1, %cst_2 [1] : vector<4x256xf32> to vector<4xf32>
    %cst_3 = arith.constant dense<0xFF800000> : vector<4xf32>
    %4 = vector.multi_reduction <maximumf>, %1, %cst_3 [1] : vector<4x256xf32> to vector<4xf32>
    %c0_i32 = arith.constant 0 : i32
    %5 = arith.cmpi eq, %arg1, %c0_i32 : i32
    %6 = arith.extui %5 : i1 to i32
    %c0_i32_4 = arith.constant 0 : i32
    %7 = arith.cmpi ne, %6, %c0_i32_4 : i32
    scf.if %7 {
      %cst_21 = arith.constant 0.000000e+00 : f32
      %26 = vector.broadcast %cst_21 : f32 to vector<4xf32>
      %c0_22 = arith.constant 0 : index
      %c0_23 = arith.constant 0 : index
      %c0_24 = arith.constant 0 : index
      %27 = vector.load %arg3[%c0_22, %c0_23, %c0_24] : memref<1x3x4xf32, #tpu.memory_space<vmem>>, vector<1x1x4xf32>
      %28 = vector.shape_cast %27 : vector<1x1x4xf32> to vector<4xf32>
      %29 = vector.shape_cast %26 : vector<4xf32> to vector<1x1x4xf32>
      tpu.vector_store %arg3[%c0_22, %c0_23, %c0_24], %29 {strides = array<i32>} : memref<1x3x4xf32, #tpu.memory_space<vmem>>, vector<1x1x4xf32>,
      %cst_25 = arith.constant 0x7F800000 : f32
      %30 = vector.broadcast %cst_25 : f32 to vector<4xf32>
      %c0_26 = arith.constant 0 : index
      %c1_27 = arith.constant 1 : index
      %c0_28 = arith.constant 0 : index
      %31 = vector.load %arg3[%c0_26, %c1_27, %c0_28] : memref<1x3x4xf32, #tpu.memory_space<vmem>>, vector<1x1x4xf32>
      %32 = vector.shape_cast %31 : vector<1x1x4xf32> to vector<4xf32>
      %33 = vector.shape_cast %30 : vector<4xf32> to vector<1x1x4xf32>
      tpu.vector_store %arg3[%c0_26, %c1_27, %c0_28], %33 {strides = array<i32>} : memref<1x3x4xf32, #tpu.memory_space<vmem>>, vector<1x1x4xf32>,
      %cst_29 = arith.constant 0xFF800000 : f32
      %34 = vector.broadcast %cst_29 : f32 to vector<4xf32>
      %c0_30 = arith.constant 0 : index
      %c2_31 = arith.constant 2 : index
      %c0_32 = arith.constant 0 : index
      %35 = vector.load %arg3[%c0_30, %c2_31, %c0_32] : memref<1x3x4xf32, #tpu.memory_space<vmem>>, vector<1x1x4xf32>
      %36 = vector.shape_cast %35 : vector<1x1x4xf32> to vector<4xf32>
      %37 = vector.shape_cast %34 : vector<4xf32> to vector<1x1x4xf32>
      tpu.vector_store %arg3[%c0_30, %c2_31, %c0_32], %37 {strides = array<i32>} : memref<1x3x4xf32, #tpu.memory_space<vmem>>, vector<1x1x4xf32>,
    } else {
    }
    %c0_5 = arith.constant 0 : index
    %c0_6 = arith.constant 0 : index
    %c0_7 = arith.constant 0 : index
    %8 = vector.load %arg3[%c0_5, %c0_6, %c0_7] : memref<1x3x4xf32, #tpu.memory_space<vmem>>, vector<1x1x4xf32>
    %9 = vector.shape_cast %8 : vector<1x1x4xf32> to vector<4xf32>
    %10 = arith.addf %9, %2 : vector<4xf32>
    %c0_8 = arith.constant 0 : index
    %c0_9 = arith.constant 0 : index
    %c0_10 = arith.constant 0 : index
    %11 = vector.load %arg3[%c0_8, %c0_9, %c0_10] : memref<1x3x4xf32, #tpu.memory_space<vmem>>, vector<1x1x4xf32>
    %12 = vector.shape_cast %11 : vector<1x1x4xf32> to vector<4xf32>
    %13 = vector.shape_cast %10 : vector<4xf32> to vector<1x1x4xf32>
    tpu.vector_store %arg3[%c0_8, %c0_9, %c0_10], %13 {strides = array<i32>} : memref<1x3x4xf32, #tpu.memory_space<vmem>>, vector<1x1x4xf32>,
    %c0_11 = arith.constant 0 : index
    %c1 = arith.constant 1 : index
    %c0_12 = arith.constant 0 : index
    %14 = vector.load %arg3[%c0_11, %c1, %c0_12] : memref<1x3x4xf32, #tpu.memory_space<vmem>>, vector<1x1x4xf32>
    %15 = vector.shape_cast %14 : vector<1x1x4xf32> to vector<4xf32>
    %16 = arith.minimumf %15, %3 : vector<4xf32>
    %c0_13 = arith.constant 0 : index
    %c1_14 = arith.constant 1 : index
    %c0_15 = arith.constant 0 : index
    %17 = vector.load %arg3[%c0_13, %c1_14, %c0_15] : memref<1x3x4xf32, #tpu.memory_space<vmem>>, vector<1x1x4xf32>
    %18 = vector.shape_cast %17 : vector<1x1x4xf32> to vector<4xf32>
    %19 = vector.shape_cast %16 : vector<4xf32> to vector<1x1x4xf32>
    tpu.vector_store %arg3[%c0_13, %c1_14, %c0_15], %19 {strides = array<i32>} : memref<1x3x4xf32, #tpu.memory_space<vmem>>, vector<1x1x4xf32>,
    %c0_16 = arith.constant 0 : index
    %c2 = arith.constant 2 : index
    %c0_17 = arith.constant 0 : index
    %20 = vector.load %arg3[%c0_16, %c2, %c0_17] : memref<1x3x4xf32, #tpu.memory_space<vmem>>, vector<1x1x4xf32>
    %21 = vector.shape_cast %20 : vector<1x1x4xf32> to vector<4xf32>
    %22 = arith.maximumf %21, %4 : vector<4xf32>
    %c0_18 = arith.constant 0 : index
    %c2_19 = arith.constant 2 : index
    %c0_20 = arith.constant 0 : index
    %23 = vector.load %arg3[%c0_18, %c2_19, %c0_20] : memref<1x3x4xf32, #tpu.memory_space<vmem>>, vector<1x1x4xf32>
    %24 = vector.shape_cast %23 : vector<1x1x4xf32> to vector<4xf32>
    %25 = vector.shape_cast %22 : vector<4xf32> to vector<1x1x4xf32>
    tpu.vector_store %arg3[%c0_18, %c2_19, %c0_20], %25 {strides = array<i32>} : memref<1x3x4xf32, #tpu.memory_space<vmem>>, vector<1x1x4xf32>,
    return
  }
  func.func @transform_0(%arg0: i32, %arg1: i32) -> (i32, i32, i32) {
    %c0_i32 = arith.constant 0 : i32
    %c0_i32_0 = arith.constant 0 : i32
    return %arg0, %c0_i32, %arg1 : i32, i32, i32
  }
  func.func @transform_1(%arg0: i32, %arg1: i32) -> (i32, i32, i32) {
    %c0_i32 = arith.constant 0 : i32
    %c0_i32_0 = arith.constant 0 : i32
    %c0_i32_1 = arith.constant 0 : i32
    return %arg0, %c0_i32, %c0_i32_0 : i32, i32, i32
  }
}

module attributes {stable_mosaic.version = 11 : i64} {
  func.func @_ctr_stats_kernel(%arg0: i32, %arg1: i32, %arg2: memref<5x4xf32, #tpu.memory_space<vmem>>, %arg3: memref<1x4x256xf32, #tpu.memory_space<vmem>>, %arg4: memref<1x3x4xf32, #tpu.memory_space<vmem>>) attributes {dimension_semantics = [#tpu.dimension_semantics<parallel>, #tpu.dimension_semantics<arbitrary>], iteration_bounds = array<i64: 2, 1>, scalar_prefetch = 0 : i64, scratch_operands = 0 : i64, tpu.core_type = #tpu.core_type<tc>, window_params = [{pipeline_mode = #tpu.pipeline_mode<synchronous>, transform_indices = @transform_0, window_bounds = array<i64: 5, 4>}, {transform_indices = @transform_1, window_bounds = array<i64: 1, 4, 256>}, {transform_indices = @transform_2, window_bounds = array<i64: 1, 3, 4>}]} {
    %c0 = arith.constant 0 : index
    %c0_0 = arith.constant 0 : index
    %c0_1 = arith.constant 0 : index
    %0 = vector.load %arg3[%c0, %c0_0, %c0_1] : memref<1x4x256xf32, #tpu.memory_space<vmem>>, vector<1x4x256xf32>
    %1 = vector.shape_cast %0 : vector<1x4x256xf32> to vector<4x256xf32>
    %c0_2 = arith.constant 0 : index
    %c0_3 = arith.constant 0 : index
    %2 = vector.load %arg2[%c0_2, %c0_3] : memref<5x4xf32, #tpu.memory_space<vmem>>, vector<1x4xf32>
    %3 = vector.shape_cast %2 : vector<1x4xf32> to vector<4xf32>
    %4 = vector.shape_cast %3 : vector<4xf32> to vector<4x1xf32>
    %5 = vector.broadcast %4 : vector<4x1xf32> to vector<4x256xf32>
    %6 = arith.subf %1, %5 : vector<4x256xf32>
    %c1 = arith.constant 1 : index
    %c0_4 = arith.constant 0 : index
    %7 = vector.load %arg2[%c1, %c0_4] : memref<5x4xf32, #tpu.memory_space<vmem>>, vector<1x4xf32>
    %8 = vector.shape_cast %7 : vector<1x4xf32> to vector<4xf32>
    %9 = vector.shape_cast %8 : vector<4xf32> to vector<4x1xf32>
    %c2 = arith.constant 2 : index
    %c0_5 = arith.constant 0 : index
    %10 = vector.load %arg2[%c2, %c0_5] : memref<5x4xf32, #tpu.memory_space<vmem>>, vector<1x4xf32>
    %11 = vector.shape_cast %10 : vector<1x4xf32> to vector<4xf32>
    %12 = vector.shape_cast %11 : vector<4xf32> to vector<4x1xf32>
    %c3 = arith.constant 3 : index
    %c0_6 = arith.constant 0 : index
    %13 = vector.load %arg2[%c3, %c0_6] : memref<5x4xf32, #tpu.memory_space<vmem>>, vector<1x4xf32>
    %14 = vector.shape_cast %13 : vector<1x4xf32> to vector<4xf32>
    %15 = vector.shape_cast %14 : vector<4xf32> to vector<4x1xf32>
    %c4 = arith.constant 4 : index
    %c0_7 = arith.constant 0 : index
    %16 = vector.load %arg2[%c4, %c0_7] : memref<5x4xf32, #tpu.memory_space<vmem>>, vector<1x4xf32>
    %17 = vector.shape_cast %16 : vector<1x4xf32> to vector<4xf32>
    %18 = vector.shape_cast %17 : vector<4xf32> to vector<4x1xf32>
    %19 = vector.broadcast %15 : vector<4x1xf32> to vector<4x256xf32>
    %20 = arith.maximumf %19, %6 : vector<4x256xf32>
    %21 = vector.broadcast %18 : vector<4x1xf32> to vector<4x256xf32>
    %22 = arith.minimumf %21, %20 : vector<4x256xf32>
    %23 = vector.broadcast %15 : vector<4x1xf32> to vector<4x256xf32>
    %24 = arith.subf %22, %23 : vector<4x256xf32>
    %25 = vector.broadcast %12 : vector<4x1xf32> to vector<4x256xf32>
    %26 = arith.mulf %24, %25 : vector<4x256xf32>
    %cst = arith.constant 5.000000e-01 : f32
    %27 = vector.broadcast %cst : f32 to vector<4x256xf32>
    %28 = arith.addf %26, %27 : vector<4x256xf32>
    %29 = math.floor %28 : vector<4x256xf32>
    %30 = vector.broadcast %9 : vector<4x1xf32> to vector<4x256xf32>
    %31 = arith.mulf %29, %30 : vector<4x256xf32>
    %32 = vector.broadcast %15 : vector<4x1xf32> to vector<4x256xf32>
    %33 = arith.addf %31, %32 : vector<4x256xf32>
    %34 = arith.mulf %33, %33 : vector<4x256xf32>
    %cst_8 = arith.constant dense<0.000000e+00> : vector<4xf32>
    %35 = vector.multi_reduction <add>, %34, %cst_8 [1] : vector<4x256xf32> to vector<4xf32>
    %cst_9 = arith.constant dense<0x7F800000> : vector<4xf32>
    %36 = vector.multi_reduction <minimumf>, %33, %cst_9 [1] : vector<4x256xf32> to vector<4xf32>
    %cst_10 = arith.constant dense<0xFF800000> : vector<4xf32>
    %37 = vector.multi_reduction <maximumf>, %33, %cst_10 [1] : vector<4x256xf32> to vector<4xf32>
    %c0_i32 = arith.constant 0 : i32
    %38 = arith.cmpi eq, %arg1, %c0_i32 : i32
    %39 = arith.extui %38 : i1 to i32
    %c0_i32_11 = arith.constant 0 : i32
    %40 = arith.cmpi ne, %39, %c0_i32_11 : i32
    scf.if %40 {
      %cst_30 = arith.constant 0.000000e+00 : f32
      %59 = vector.broadcast %cst_30 : f32 to vector<4xf32>
      %c0_31 = arith.constant 0 : index
      %c0_32 = arith.constant 0 : index
      %c0_33 = arith.constant 0 : index
      %60 = vector.load %arg4[%c0_31, %c0_32, %c0_33] : memref<1x3x4xf32, #tpu.memory_space<vmem>>, vector<1x1x4xf32>
      %61 = vector.shape_cast %60 : vector<1x1x4xf32> to vector<4xf32>
      %62 = vector.shape_cast %59 : vector<4xf32> to vector<1x1x4xf32>
      tpu.vector_store %arg4[%c0_31, %c0_32, %c0_33], %62 {strides = array<i32>} : memref<1x3x4xf32, #tpu.memory_space<vmem>>, vector<1x1x4xf32>,
      %cst_34 = arith.constant 0x7F800000 : f32
      %63 = vector.broadcast %cst_34 : f32 to vector<4xf32>
      %c0_35 = arith.constant 0 : index
      %c1_36 = arith.constant 1 : index
      %c0_37 = arith.constant 0 : index
      %64 = vector.load %arg4[%c0_35, %c1_36, %c0_37] : memref<1x3x4xf32, #tpu.memory_space<vmem>>, vector<1x1x4xf32>
      %65 = vector.shape_cast %64 : vector<1x1x4xf32> to vector<4xf32>
      %66 = vector.shape_cast %63 : vector<4xf32> to vector<1x1x4xf32>
      tpu.vector_store %arg4[%c0_35, %c1_36, %c0_37], %66 {strides = array<i32>} : memref<1x3x4xf32, #tpu.memory_space<vmem>>, vector<1x1x4xf32>,
      %cst_38 = arith.constant 0xFF800000 : f32
      %67 = vector.broadcast %cst_38 : f32 to vector<4xf32>
      %c0_39 = arith.constant 0 : index
      %c2_40 = arith.constant 2 : index
      %c0_41 = arith.constant 0 : index
      %68 = vector.load %arg4[%c0_39, %c2_40, %c0_41] : memref<1x3x4xf32, #tpu.memory_space<vmem>>, vector<1x1x4xf32>
      %69 = vector.shape_cast %68 : vector<1x1x4xf32> to vector<4xf32>
      %70 = vector.shape_cast %67 : vector<4xf32> to vector<1x1x4xf32>
      tpu.vector_store %arg4[%c0_39, %c2_40, %c0_41], %70 {strides = array<i32>} : memref<1x3x4xf32, #tpu.memory_space<vmem>>, vector<1x1x4xf32>,
    } else {
    }
    %c0_12 = arith.constant 0 : index
    %c0_13 = arith.constant 0 : index
    %c0_14 = arith.constant 0 : index
    %41 = vector.load %arg4[%c0_12, %c0_13, %c0_14] : memref<1x3x4xf32, #tpu.memory_space<vmem>>, vector<1x1x4xf32>
    %42 = vector.shape_cast %41 : vector<1x1x4xf32> to vector<4xf32>
    %43 = arith.addf %42, %35 : vector<4xf32>
    %c0_15 = arith.constant 0 : index
    %c0_16 = arith.constant 0 : index
    %c0_17 = arith.constant 0 : index
    %44 = vector.load %arg4[%c0_15, %c0_16, %c0_17] : memref<1x3x4xf32, #tpu.memory_space<vmem>>, vector<1x1x4xf32>
    %45 = vector.shape_cast %44 : vector<1x1x4xf32> to vector<4xf32>
    %46 = vector.shape_cast %43 : vector<4xf32> to vector<1x1x4xf32>
    tpu.vector_store %arg4[%c0_15, %c0_16, %c0_17], %46 {strides = array<i32>} : memref<1x3x4xf32, #tpu.memory_space<vmem>>, vector<1x1x4xf32>,
    %c0_18 = arith.constant 0 : index
    %c1_19 = arith.constant 1 : index
    %c0_20 = arith.constant 0 : index
    %47 = vector.load %arg4[%c0_18, %c1_19, %c0_20] : memref<1x3x4xf32, #tpu.memory_space<vmem>>, vector<1x1x4xf32>
    %48 = vector.shape_cast %47 : vector<1x1x4xf32> to vector<4xf32>
    %49 = arith.minimumf %48, %36 : vector<4xf32>
    %c0_21 = arith.constant 0 : index
    %c1_22 = arith.constant 1 : index
    %c0_23 = arith.constant 0 : index
    %50 = vector.load %arg4[%c0_21, %c1_22, %c0_23] : memref<1x3x4xf32, #tpu.memory_space<vmem>>, vector<1x1x4xf32>
    %51 = vector.shape_cast %50 : vector<1x1x4xf32> to vector<4xf32>
    %52 = vector.shape_cast %49 : vector<4xf32> to vector<1x1x4xf32>
    tpu.vector_store %arg4[%c0_21, %c1_22, %c0_23], %52 {strides = array<i32>} : memref<1x3x4xf32, #tpu.memory_space<vmem>>, vector<1x1x4xf32>,
    %c0_24 = arith.constant 0 : index
    %c2_25 = arith.constant 2 : index
    %c0_26 = arith.constant 0 : index
    %53 = vector.load %arg4[%c0_24, %c2_25, %c0_26] : memref<1x3x4xf32, #tpu.memory_space<vmem>>, vector<1x1x4xf32>
    %54 = vector.shape_cast %53 : vector<1x1x4xf32> to vector<4xf32>
    %55 = arith.maximumf %54, %37 : vector<4xf32>
    %c0_27 = arith.constant 0 : index
    %c2_28 = arith.constant 2 : index
    %c0_29 = arith.constant 0 : index
    %56 = vector.load %arg4[%c0_27, %c2_28, %c0_29] : memref<1x3x4xf32, #tpu.memory_space<vmem>>, vector<1x1x4xf32>
    %57 = vector.shape_cast %56 : vector<1x1x4xf32> to vector<4xf32>
    %58 = vector.shape_cast %55 : vector<4xf32> to vector<1x1x4xf32>
    tpu.vector_store %arg4[%c0_27, %c2_28, %c0_29], %58 {strides = array<i32>} : memref<1x3x4xf32, #tpu.memory_space<vmem>>, vector<1x1x4xf32>,
    return
  }
  func.func @transform_0(%arg0: i32, %arg1: i32) -> (i32, i32) {
    %c0_i32 = arith.constant 0 : i32
    %c0_i32_0 = arith.constant 0 : i32
    %c0_i32_1 = arith.constant 0 : i32
    return %c0_i32, %c0_i32_0 : i32, i32
  }
  func.func @transform_1(%arg0: i32, %arg1: i32) -> (i32, i32, i32) {
    %c0_i32 = arith.constant 0 : i32
    %c0_i32_0 = arith.constant 0 : i32
    return %arg0, %c0_i32, %arg1 : i32, i32, i32
  }
  func.func @transform_2(%arg0: i32, %arg1: i32) -> (i32, i32, i32) {
    %c0_i32 = arith.constant 0 : i32
    %c0_i32_0 = arith.constant 0 : i32
    %c0_i32_1 = arith.constant 0 : i32
    return %arg0, %c0_i32, %c0_i32_0 : i32, i32, i32
  }
}

module attributes {stable_mosaic.version = 11 : i64} {
  func.func @_apply_kernel(%arg0: i32, %arg1: i32, %arg2: memref<16x4xf32, #tpu.memory_space<vmem>>, %arg3: memref<1x4x256xf32, #tpu.memory_space<vmem>>, %arg4: memref<1x4x256xf32, #tpu.memory_space<vmem>>) attributes {dimension_semantics = [#tpu.dimension_semantics<parallel>, #tpu.dimension_semantics<parallel>], iteration_bounds = array<i64: 2, 1>, scalar_prefetch = 0 : i64, scratch_operands = 0 : i64, tpu.core_type = #tpu.core_type<tc>, window_params = [{pipeline_mode = #tpu.pipeline_mode<synchronous>, transform_indices = @transform_0, window_bounds = array<i64: 16, 4>}, {transform_indices = @transform_1, window_bounds = array<i64: 1, 4, 256>}, {transform_indices = @transform_2, window_bounds = array<i64: 1, 4, 256>}]} {
    %c0 = arith.constant 0 : index
    %c0_0 = arith.constant 0 : index
    %c0_1 = arith.constant 0 : index
    %0 = vector.load %arg3[%c0, %c0_0, %c0_1] : memref<1x4x256xf32, #tpu.memory_space<vmem>>, vector<1x4x256xf32>
    %1 = vector.shape_cast %0 : vector<1x4x256xf32> to vector<4x256xf32>
    %c0_2 = arith.constant 0 : index
    %c0_3 = arith.constant 0 : index
    %2 = vector.load %arg2[%c0_2, %c0_3] : memref<16x4xf32, #tpu.memory_space<vmem>>, vector<1x4xf32>
    %3 = vector.shape_cast %2 : vector<1x4xf32> to vector<4xf32>
    %4 = vector.shape_cast %3 : vector<4xf32> to vector<4x1xf32>
    %5 = vector.broadcast %4 : vector<4x1xf32> to vector<4x256xf32>
    %6 = arith.subf %1, %5 : vector<4x256xf32>
    %c1 = arith.constant 1 : index
    %c0_4 = arith.constant 0 : index
    %7 = vector.load %arg2[%c1, %c0_4] : memref<16x4xf32, #tpu.memory_space<vmem>>, vector<1x4xf32>
    %8 = vector.shape_cast %7 : vector<1x4xf32> to vector<4xf32>
    %9 = vector.shape_cast %8 : vector<4xf32> to vector<4x1xf32>
    %c2 = arith.constant 2 : index
    %c0_5 = arith.constant 0 : index
    %10 = vector.load %arg2[%c2, %c0_5] : memref<16x4xf32, #tpu.memory_space<vmem>>, vector<1x4xf32>
    %11 = vector.shape_cast %10 : vector<1x4xf32> to vector<4xf32>
    %12 = vector.shape_cast %11 : vector<4xf32> to vector<4x1xf32>
    %c3 = arith.constant 3 : index
    %c0_6 = arith.constant 0 : index
    %13 = vector.load %arg2[%c3, %c0_6] : memref<16x4xf32, #tpu.memory_space<vmem>>, vector<1x4xf32>
    %14 = vector.shape_cast %13 : vector<1x4xf32> to vector<4xf32>
    %15 = vector.shape_cast %14 : vector<4xf32> to vector<4x1xf32>
    %c4 = arith.constant 4 : index
    %c0_7 = arith.constant 0 : index
    %16 = vector.load %arg2[%c4, %c0_7] : memref<16x4xf32, #tpu.memory_space<vmem>>, vector<1x4xf32>
    %17 = vector.shape_cast %16 : vector<1x4xf32> to vector<4xf32>
    %18 = vector.shape_cast %17 : vector<4xf32> to vector<4x1xf32>
    %19 = vector.broadcast %15 : vector<4x1xf32> to vector<4x256xf32>
    %20 = arith.maximumf %19, %6 : vector<4x256xf32>
    %21 = vector.broadcast %18 : vector<4x1xf32> to vector<4x256xf32>
    %22 = arith.minimumf %21, %20 : vector<4x256xf32>
    %23 = vector.broadcast %15 : vector<4x1xf32> to vector<4x256xf32>
    %24 = arith.subf %22, %23 : vector<4x256xf32>
    %25 = vector.broadcast %12 : vector<4x1xf32> to vector<4x256xf32>
    %26 = arith.mulf %24, %25 : vector<4x256xf32>
    %cst = arith.constant 5.000000e-01 : f32
    %27 = vector.broadcast %cst : f32 to vector<4x256xf32>
    %28 = arith.addf %26, %27 : vector<4x256xf32>
    %29 = math.floor %28 : vector<4x256xf32>
    %30 = vector.broadcast %9 : vector<4x1xf32> to vector<4x256xf32>
    %31 = arith.mulf %29, %30 : vector<4x256xf32>
    %32 = vector.broadcast %15 : vector<4x1xf32> to vector<4x256xf32>
    %33 = arith.addf %31, %32 : vector<4x256xf32>
    %c5 = arith.constant 5 : index
    %c0_8 = arith.constant 0 : index
    %34 = vector.load %arg2[%c5, %c0_8] : memref<16x4xf32, #tpu.memory_space<vmem>>, vector<1x4xf32>
    %35 = vector.shape_cast %34 : vector<1x4xf32> to vector<4xf32>
    %36 = vector.shape_cast %35 : vector<4xf32> to vector<4x1xf32>
    %37 = vector.broadcast %36 : vector<4x1xf32> to vector<4x256xf32>
    %38 = arith.mulf %33, %37 : vector<4x256xf32>
    %c6 = arith.constant 6 : index
    %c0_9 = arith.constant 0 : index
    %39 = vector.load %arg2[%c6, %c0_9] : memref<16x4xf32, #tpu.memory_space<vmem>>, vector<1x4xf32>
    %40 = vector.shape_cast %39 : vector<1x4xf32> to vector<4xf32>
    %41 = vector.shape_cast %40 : vector<4xf32> to vector<4x1xf32>
    %c7 = arith.constant 7 : index
    %c0_10 = arith.constant 0 : index
    %42 = vector.load %arg2[%c7, %c0_10] : memref<16x4xf32, #tpu.memory_space<vmem>>, vector<1x4xf32>
    %43 = vector.shape_cast %42 : vector<1x4xf32> to vector<4xf32>
    %44 = vector.shape_cast %43 : vector<4xf32> to vector<4x1xf32>
    %c8 = arith.constant 8 : index
    %c0_11 = arith.constant 0 : index
    %45 = vector.load %arg2[%c8, %c0_11] : memref<16x4xf32, #tpu.memory_space<vmem>>, vector<1x4xf32>
    %46 = vector.shape_cast %45 : vector<1x4xf32> to vector<4xf32>
    %47 = vector.shape_cast %46 : vector<4xf32> to vector<4x1xf32>
    %c9 = arith.constant 9 : index
    %c0_12 = arith.constant 0 : index
    %48 = vector.load %arg2[%c9, %c0_12] : memref<16x4xf32, #tpu.memory_space<vmem>>, vector<1x4xf32>
    %49 = vector.shape_cast %48 : vector<1x4xf32> to vector<4xf32>
    %50 = vector.shape_cast %49 : vector<4xf32> to vector<4x1xf32>
    %51 = vector.broadcast %47 : vector<4x1xf32> to vector<4x256xf32>
    %52 = arith.maximumf %51, %38 : vector<4x256xf32>
    %53 = vector.broadcast %50 : vector<4x1xf32> to vector<4x256xf32>
    %54 = arith.minimumf %53, %52 : vector<4x256xf32>
    %55 = vector.broadcast %47 : vector<4x1xf32> to vector<4x256xf32>
    %56 = arith.subf %54, %55 : vector<4x256xf32>
    %57 = vector.broadcast %44 : vector<4x1xf32> to vector<4x256xf32>
    %58 = arith.mulf %56, %57 : vector<4x256xf32>
    %cst_13 = arith.constant 5.000000e-01 : f32
    %59 = vector.broadcast %cst_13 : f32 to vector<4x256xf32>
    %60 = arith.addf %58, %59 : vector<4x256xf32>
    %61 = math.floor %60 : vector<4x256xf32>
    %62 = vector.broadcast %41 : vector<4x1xf32> to vector<4x256xf32>
    %63 = arith.mulf %61, %62 : vector<4x256xf32>
    %64 = vector.broadcast %47 : vector<4x1xf32> to vector<4x256xf32>
    %65 = arith.addf %63, %64 : vector<4x256xf32>
    %c10 = arith.constant 10 : index
    %c0_14 = arith.constant 0 : index
    %66 = vector.load %arg2[%c10, %c0_14] : memref<16x4xf32, #tpu.memory_space<vmem>>, vector<1x4xf32>
    %67 = vector.shape_cast %66 : vector<1x4xf32> to vector<4xf32>
    %68 = vector.shape_cast %67 : vector<4xf32> to vector<4x1xf32>
    %69 = vector.broadcast %68 : vector<4x1xf32> to vector<4x256xf32>
    %70 = arith.mulf %69, %65 : vector<4x256xf32>
    %c11 = arith.constant 11 : index
    %c0_15 = arith.constant 0 : index
    %71 = vector.load %arg2[%c11, %c0_15] : memref<16x4xf32, #tpu.memory_space<vmem>>, vector<1x4xf32>
    %72 = vector.shape_cast %71 : vector<1x4xf32> to vector<4xf32>
    %73 = vector.shape_cast %72 : vector<4xf32> to vector<4x1xf32>
    %74 = vector.broadcast %73 : vector<4x1xf32> to vector<4x256xf32>
    %75 = arith.addf %70, %74 : vector<4x256xf32>
    %c12 = arith.constant 12 : index
    %c0_16 = arith.constant 0 : index
    %76 = vector.load %arg2[%c12, %c0_16] : memref<16x4xf32, #tpu.memory_space<vmem>>, vector<1x4xf32>
    %77 = vector.shape_cast %76 : vector<1x4xf32> to vector<4xf32>
    %78 = vector.shape_cast %77 : vector<4xf32> to vector<4x1xf32>
    %c13 = arith.constant 13 : index
    %c0_17 = arith.constant 0 : index
    %79 = vector.load %arg2[%c13, %c0_17] : memref<16x4xf32, #tpu.memory_space<vmem>>, vector<1x4xf32>
    %80 = vector.shape_cast %79 : vector<1x4xf32> to vector<4xf32>
    %81 = vector.shape_cast %80 : vector<4xf32> to vector<4x1xf32>
    %c14 = arith.constant 14 : index
    %c0_18 = arith.constant 0 : index
    %82 = vector.load %arg2[%c14, %c0_18] : memref<16x4xf32, #tpu.memory_space<vmem>>, vector<1x4xf32>
    %83 = vector.shape_cast %82 : vector<1x4xf32> to vector<4xf32>
    %84 = vector.shape_cast %83 : vector<4xf32> to vector<4x1xf32>
    %c15 = arith.constant 15 : index
    %c0_19 = arith.constant 0 : index
    %85 = vector.load %arg2[%c15, %c0_19] : memref<16x4xf32, #tpu.memory_space<vmem>>, vector<1x4xf32>
    %86 = vector.shape_cast %85 : vector<1x4xf32> to vector<4xf32>
    %87 = vector.shape_cast %86 : vector<4xf32> to vector<4x1xf32>
    %88 = vector.broadcast %84 : vector<4x1xf32> to vector<4x256xf32>
    %89 = arith.maximumf %88, %75 : vector<4x256xf32>
    %90 = vector.broadcast %87 : vector<4x1xf32> to vector<4x256xf32>
    %91 = arith.minimumf %90, %89 : vector<4x256xf32>
    %92 = vector.broadcast %84 : vector<4x1xf32> to vector<4x256xf32>
    %93 = arith.subf %91, %92 : vector<4x256xf32>
    %94 = vector.broadcast %81 : vector<4x1xf32> to vector<4x256xf32>
    %95 = arith.mulf %93, %94 : vector<4x256xf32>
    %cst_20 = arith.constant 5.000000e-01 : f32
    %96 = vector.broadcast %cst_20 : f32 to vector<4x256xf32>
    %97 = arith.addf %95, %96 : vector<4x256xf32>
    %98 = math.floor %97 : vector<4x256xf32>
    %99 = vector.broadcast %78 : vector<4x1xf32> to vector<4x256xf32>
    %100 = arith.mulf %98, %99 : vector<4x256xf32>
    %101 = vector.broadcast %84 : vector<4x1xf32> to vector<4x256xf32>
    %102 = arith.addf %100, %101 : vector<4x256xf32>
    %c0_21 = arith.constant 0 : index
    %c0_22 = arith.constant 0 : index
    %c0_23 = arith.constant 0 : index
    %103 = vector.load %arg4[%c0_21, %c0_22, %c0_23] : memref<1x4x256xf32, #tpu.memory_space<vmem>>, vector<1x4x256xf32>
    %104 = vector.shape_cast %103 : vector<1x4x256xf32> to vector<4x256xf32>
    %105 = vector.shape_cast %102 : vector<4x256xf32> to vector<1x4x256xf32>
    tpu.vector_store %arg4[%c0_21, %c0_22, %c0_23], %105 {strides = array<i32>} : memref<1x4x256xf32, #tpu.memory_space<vmem>>, vector<1x4x256xf32>,
    return
  }
  func.func @transform_0(%arg0: i32, %arg1: i32) -> (i32, i32) {
    %c0_i32 = arith.constant 0 : i32
    %c0_i32_0 = arith.constant 0 : i32
    %c0_i32_1 = arith.constant 0 : i32
    return %c0_i32, %c0_i32_0 : i32, i32
  }
  func.func @transform_1(%arg0: i32, %arg1: i32) -> (i32, i32, i32) {
    %c0_i32 = arith.constant 0 : i32
    %c0_i32_0 = arith.constant 0 : i32
    return %arg0, %c0_i32, %arg1 : i32, i32, i32
  }
  func.func @transform_2(%arg0: i32, %arg1: i32) -> (i32, i32, i32) {
    %c0_i32 = arith.constant 0 : i32
    %c0_i32_0 = arith.constant 0 : i32
    return %arg0, %c0_i32, %arg1 : i32, i32, i32
  }
}

</mosaic_0001>

<bundles_post_ra>
// kernel: quantized_batchnorm.3
= control target key start
LH: loop header
LB: loop body
LE: loop exit
PB: predicated region body
PF: predicated region fallthrough
CT: control target
= control target key end

     0   :  { %s344_s6 = smov 0   ;;  %s346_s7 = smov 0   ;;  %s394_s0 = inlined_call_operand.vmem [shape: f32[2,4,256], index: 0, kind: input, shape index: {}]   ;;  %s395_s1 = inlined_call_operand.vmem [shape: f32[2,3,4], index: 1, kind: output, shape index: {}]  }
   0x1   :  { %s348_s8 = smov 0  }
   0x2 LB: > { %s23_s9 = sadd.s32 1, %s325_s7  ;;  %p272_p0 = scmp.ge.s32.totalorder %s329_s8, 1  ;;  %s329_s8 = sphi %s348_s8, %s11_s8   ;;  %s325_s7 = sphi %s346_s7, %s397_s7   ;;  %s321_s6 = sphi %s344_s6, %s396_s6  }
   0x3   : > { %p25_p1 = scmp.ge.s32.totalorder %s23_s9, 2  ;;  %p106_p2 = scmp.lt.s32.totalorder %s329_s8, 3 }
   0x5   : > { %s399_s9 = smov (%p25_p1, %s23_s9), 0  ;;  %p107_p3 = pnand %p272_p0, %p106_p2 }
   0x6   : > { %p130_p4 = scmp.lt.s32.totalorder (!%p107_p3), %s321_s6, 1 }
   0x7   : > { %110 = sbr.rel (%p107_p3) target bundleno = 168 (0xa8), region = 24 }
   0xc   : > { %s401_s6 = smov (!%p130_p4, %s321_s6), 1  ;;  %vm167_vm0 = vcmask 24576   ;;  %vm147_vm1 = vcmask 1043456   ;;  %v331_v1 = vmov 0.0   ;;  %v332_v12 = vmov -inf  }
   0xd   : > { %s278_s10 = sshll.u32 %s401_s6, 3  ;;  %s275_s11 = sshll.u32 %s401_s6, 2  ;;  %v333_v13 = vmov inf   ;;  %v173_v14 = vlaneseq }
   0xe   : > { %s137_s14 = scalar_lea.vmem %s394_s0, %s278_s10  ;;  %s368_s17 = scalar_lea.vmem %s395_s1, %s275_s11 }
   0xf   : > { %v143_v0 = vld [vmem:[%s137_s14] sm:$0xff]  ;;  %168 = vst.msk [vmem:[%s368_s17] sm:$0x1] %vm167_vm0, %v331_v1  ;;  %170 = vst.msk [vmem:[%s368_s17 + $0x2] sm:$0x1] %vm167_vm0, %v332_v12  ;;  %v174_v15 = vand.u32 127, %v173_v14 }
  0x10   : > { %v145_v2 = vcombine.high %v143_v0, %v143_v0  ;;  %v148_v3 = vsel %vm147_vm1, %v143_v0, 0.0  ;;  %v158_v4 = vsel %vm147_vm1, %v143_v0, -inf  ;;  %v153_v7 = vsel %vm147_vm1, %v143_v0, inf  ;;  %169 = vst.msk [vmem:[%s368_s17 + $0x1] sm:$0x1] %vm167_vm0, %v333_v13 }
  0x11   : > { %v176_v16 = vshrl.u32 %v173_v14, 7 }
  0x12   : > { %v149_v5 = vsel %vm147_vm1, %v145_v2, 0.0  ;;  %v159_v6 = vsel %vm147_vm1, %v145_v2, -inf  ;;  %v154_v8 = vsel %vm147_vm1, %v145_v2, inf }
  0x13   : > { %v150_v9 = vadd.f32 %v149_v5, %v148_v3  ;;  %v160_v10 = vmax.f32 %v158_v4, %v159_v6  ;;  %v155_v11 = vmin.f32 %v153_v7, %v154_v8  ;;  %v177_v17 = vsub.s32 %v174_v15, %v176_v16 }
  0x15   : > { %151 = vadd.xlane.f32.xlu0 %v150_v9  ;;  %161 = vmax.xlane.f32.xlu1 %v160_v10 }
  0x16   : > { %v171_v18 = vld [vmem:[%s368_s17] sm:$0x1]  ;;  %v192_v20 = vld [vmem:[%s368_s17 + $0x2] sm:$0x1] }
  0x17   : > { %v183_v26 = vld [vmem:[%s368_s17 + $0x1] sm:$0x1] }
  0x19   : > { %156 = vmin.xlane.f32.xlu0 %v155_v11 }
  0x9e   : > { %v152_v19 = vpop.xlane.xlu0 %151  ;;  %v162_v21 = vpop.xlane.xlu1 %161 }
  0x9f   : > { %v178_v22 = vrot.slane %v152_v19, %v177_v17  ;;  %v197_v23 = vrot.slane %v162_v21, %v177_v17 }
  0xa1   : > { %v180_v24 = vadd.f32 %v178_v22, %v171_v18  ;;  %v199_v25 = vmax.f32 %v192_v20, %v197_v23 }
  0xa2   : > { %v157_v27 = vpop.xlane.xlu0 %156 }
  0xa3   : > { %182 = vst.msk [vmem:[%s368_s17] sm:$0x1] %vm167_vm0, %v180_v24  ;;  %200 = vst.msk [vmem:[%s368_s17 + $0x2] sm:$0x1] %vm167_vm0, %v199_v25  ;;  %v188_v28 = vrot.slane %v157_v27, %v177_v17 }
  0xa5   : > { %v190_v29 = vmin.f32 %v183_v26, %v188_v28 }
  0xa7   : > { %191 = vst.msk [vmem:[%s368_s17 + $0x1] sm:$0x1] %vm167_vm0, %v190_v29 }
  0xa8 PF: > { %s11_s8 = sadd.s32 1, %s329_s8   ;;  %s396_s6 = smov %s325_s7 }
  0xa9   : > { %p8_p5 = scmp.ge.s32.totalorder %s11_s8, 4   ;;  %s397_s7 = smov %s399_s9 }
  0xab   :  { %10 = sbr.rel (!%p8_p5) target bundleno = 2 (0x2), region = 58 }

// kernel: quantized_batchnorm.4
= control target key start
LH: loop header
LB: loop body
LE: loop exit
PB: predicated region body
PF: predicated region fallthrough
CT: control target
= control target key end

     0   :  { %s450_s9 = smov 0   ;;  %s452_s10 = smov 0   ;;  %s520_s0 = inlined_call_operand.vmem [shape: f32[5,4], index: 0, kind: input, shape index: {}]   ;;  %s521_s1 = inlined_call_operand.vmem [shape: f32[2,4,256], index: 1, kind: input, shape index: {}]   ;;  %s522_s2 = inlined_call_operand.vmem [shape: f32[2,3,4], index: 2, kind: output, shape index: {}]  }
   0x1   :  { %s454_s11 = smov 0  }
   0x2 LB: > { %s24_s12 = sadd.s32 1, %s425_s10  ;;  %p367_p0 = scmp.ge.s32.totalorder %s429_s11, 1  ;;  %s429_s11 = sphi %s454_s11, %s12_s11   ;;  %s425_s10 = sphi %s452_s10, %s524_s10   ;;  %s421_s9 = sphi %s450_s9, %s523_s9  }
   0x3   : > { %p26_p1 = scmp.ge.s32.totalorder %s24_s12, 2  ;;  %p131_p2 = scmp.lt.s32.totalorder %s429_s11, 3 }
   0x5   : > { %s526_s12 = smov (%p26_p1, %s24_s12), 0  ;;  %p132_p3 = pnand %p367_p0, %p131_p2 }
   0x6   : > { %p157_p4 = scmp.lt.s32.totalorder (!%p132_p3), %s421_s9, 1 }
   0x7   : > { %135 = sbr.rel (%p132_p3) target bundleno = 300 (0x12c), region = 28 }
   0xc   : > { %v371_v0 = vld [vmem:[%s520_s0] ss:$0 sm:$0xff]  ;;  %v375_v1 = vld [vmem:[%s520_s0 + $0x4] ss:$0 sm:$0xff]  ;;  %v374_v2 = vld [vmem:[%s520_s0 + $0x3] ss:$0 sm:$0xff]  ;;  %v183_v5 = vlaneseq }
   0xd   : > { %177 = vbcast.lane.b32.xlu0 %v371_v0, 256  ;;  %219 = vbcast.lane.b32.xlu1 %v375_v1, 256  ;;  %v373_v3 = vld [vmem:[%s520_s0 + $0x2] ss:$0 sm:$0xff]  ;;  %v372_v4 = vld [vmem:[%s520_s0 + $0x1] ss:$0 sm:$0xff] }
   0xe   : > { %s528_s9 = smov (!%p157_p4, %s421_s9), 1  ;;  %v184_v6 = vshrl.u32 %v183_v5, 7  ;;  %vm262_vm0 = vcmask 24576   ;;  %v269_v7 = vand.u32 127, %v183_v5  ;;  %v431_v8 = vmov inf  }
   0xf   : > { %s370_s23 = sshll.u32 %s528_s9, 2  ;;  %v432_v10 = vmov 839922192   ;;  %s378_s27 = sshll.u32 %s528_s9, 3  ;;  %vm242_vm1 = vcmask 1043456   ;;  %v433_v50 = vmov 0.0  }
  0x10   : > { %s486_s26 = scalar_lea.vmem %s522_s2, %s370_s23  ;;  %v490_v9 = vsub.s32 %v269_v7, %v184_v6  ;;  %v181_v11 = vunpack.c.l.s4 %v432_v10  ;;  %s164_s30 = scalar_lea.vmem %s521_s1, %s378_s27  ;;  %v434_v51 = vmov -inf  }
  0x11   : > { %211 = vbcast.lane.b32.xlu0 %v374_v2, 256  ;;  %203 = vbcast.lane.b32.xlu1 %v373_v3, 256  ;;  %264 = vst.msk [vmem:[%s486_s26 + $0x1] sm:$0x1] %vm262_vm0, %v431_v8  ;;  %v170_v15 = vld [vmem:[%s164_s30] sm:$0xff] }
  0x12   : > { %v182_v12 = vunpack.c.0.s8 %v181_v11  ;;  %263 = vst.msk [vmem:[%s486_s26] sm:$0x1] %vm262_vm0, %v433_v50  ;;  %265 = vst.msk [vmem:[%s486_s26 + $0x2] sm:$0x1] %vm262_vm0, %v434_v51 }
  0x14   : > { %v185_v13 = vsub.s32 %v182_v12, %v184_v6 }
  0x15   : > { %195 = vbcast.lane.b32.xlu0 %v372_v4, 256 }
  0x18   : > { %v278_v52 = vld [vmem:[%s486_s26 + $0x1] sm:$0x1] }
  0x19   : > { %v266_v55 = vld [vmem:[%s486_s26] sm:$0x1]  ;;  %v287_v59 = vld [vmem:[%s486_s26 + $0x2] sm:$0x1] }
  0x7f   : > { %v178_v14 = vpop.permute.xlu0 %177  ;;  %v220_v17 = vpop.permute.xlu1 %219 }
  0x80   : > { %v186_v16 = vrot.slane %v178_v14, %v185_v13 }
  0x82   : > { %v188_v18 = vsub.f32 %v170_v15, %v186_v16 }
  0x83   : > { %v212_v19 = vpop.permute.xlu0 %211  ;;  %v204_v24 = vpop.permute.xlu1 %203 }
  0x84   : > { %v222_v20 = vcombine.high %v188_v18, %v188_v18  ;;  %v224_v21 = vmax.f32 %v212_v19, %v188_v18 }
  0x86   : > { %v225_v22 = vmax.f32 %v212_v19, %v222_v20  ;;  %v226_v23 = vmin.f32 %v220_v17, %v224_v21 }
  0x87   : > { %v196_v31 = vpop.permute.xlu0 %195 }
  0x88   : > { %v227_v25 = vmin.f32 %v220_v17, %v225_v22  ;;  %v228_v26 = vsub.f32 %v226_v23, %v212_v19 }
  0x8a   : > { %v229_v27 = vsub.f32 %v227_v25, %v212_v19  ;;  %v230_v28 = vmul.f32 %v228_v26, %v204_v24 }
  0x8c   : > { %v231_v29 = vmul.f32 %v229_v27, %v204_v24  ;;  %v232_v30 = vadd.f32 0.5, %v230_v28 }
  0x8e   : > { %v233_v32 = vadd.f32 0.5, %v231_v29  ;;  %v234_v33 = vfloor.f32 %v232_v30 }
  0x90   : > { %v235_v34 = vfloor.f32 %v233_v32  ;;  %v236_v35 = vmul.f32 %v234_v33, %v196_v31 }
  0x92   : > { %v237_v36 = vmul.f32 %v235_v34, %v196_v31  ;;  %v238_v37 = vadd.f32 %v236_v35, %v212_v19 }
  0x94   : > { %v239_v38 = vadd.f32 %v237_v36, %v212_v19  ;;  %v240_v39 = vmul.f32 %v238_v37, %v238_v37  ;;  %v248_v40 = vsel %vm242_vm1, %v238_v37, inf  ;;  %v253_v48 = vsel %vm242_vm1, %v238_v37, -inf }
  0x96   : > { %v249_v41 = vsel %vm242_vm1, %v239_v38, inf  ;;  %v241_v42 = vmul.f32 %v239_v38, %v239_v38  ;;  %v243_v44 = vsel %vm242_vm1, %v240_v39, 0.0  ;;  %v254_v46 = vsel %vm242_vm1, %v239_v38, -inf }
  0x97   : > { %v250_v43 = vmin.f32 %v248_v40, %v249_v41  ;;  %v255_v49 = vmax.f32 %v253_v48, %v254_v46 }
  0x98   : > { %v244_v45 = vsel %vm242_vm1, %v241_v42, 0.0 }
  0x99   : > { %251 = vmin.xlane.f32.xlu0 %v250_v43  ;;  %v245_v47 = vadd.f32 %v244_v45, %v243_v44 }
  0x9b   : > { %246 = vadd.xlane.f32.xlu1 %v245_v47 }
  0x9d   : > { %256 = vmax.xlane.f32.xlu0 %v255_v49 }
 0x122   : > { %v252_v53 = vpop.xlane.xlu0 %251 }
 0x123   : > { %v283_v54 = vrot.slane %v252_v53, %v490_v9 }
 0x124   : > { %v247_v56 = vpop.xlane.xlu1 %246 }
 0x125   : > { %v285_v57 = vmin.f32 %v278_v52, %v283_v54  ;;  %v273_v58 = vrot.slane %v247_v56, %v490_v9 }
 0x126   : > { %v257_v60 = vpop.xlane.xlu0 %256 }
 0x127   : > { %286 = vst.msk [vmem:[%s486_s26 + $0x1] sm:$0x1] %vm262_vm0, %v285_v57  ;;  %v275_v61 = vadd.f32 %v273_v58, %v266_v55  ;;  %v292_v62 = vrot.slane %v257_v60, %v490_v9 }
 0x129   : > { %277 = vst.msk [vmem:[%s486_s26] sm:$0x1] %vm262_vm0, %v275_v61  ;;  %v294_v63 = vmax.f32 %v287_v59, %v292_v62 }
 0x12b   : > { %295 = vst.msk [vmem:[%s486_s26 + $0x2] sm:$0x1] %vm262_vm0, %v294_v63 }
 0x12c PF: > { %s12_s11 = sadd.s32 1, %s429_s11   ;;  %s523_s9 = smov %s425_s10 }
 0x12d   : > { %p9_p5 = scmp.ge.s32.totalorder %s12_s11, 4   ;;  %s524_s10 = smov %s526_s12 }
 0x12f   :  { %11 = sbr.rel (!%p9_p5) target bundleno = 2 (0x2), region = 62 }

// kernel: quantized_batchnorm.5
= control target key start
LH: loop header
LB: loop body
LE: loop exit
PB: predicated region body
PF: predicated region fallthrough
CT: control target
= control target key end

     0   :  { %s565_s9 = smov 0   ;;  %s567_s10 = smov 0   ;;  %s657_s0 = inlined_call_operand.vmem [shape: f32[16,4], index: 0, kind: input, shape index: {}]   ;;  %s658_s1 = inlined_call_operand.vmem [shape: f32[2,4,256], index: 1, kind: input, shape index: {}]   ;;  %s659_s2 = inlined_call_operand.vmem [shape: f32[2,4,256], index: 2, kind: output, shape index: {}]  }
   0x1   :  { %s569_s11 = smov 0  }
   0x2 LB: > { %s24_s12 = sadd.s32 1, %s543_s10  ;;  %p475_p0 = scmp.ge.s32.totalorder %s547_s11, 1  ;;  %s547_s11 = sphi %s569_s11, %s12_s11   ;;  %s543_s10 = sphi %s567_s10, %s661_s10   ;;  %s539_s9 = sphi %s565_s9, %s660_s9  }
   0x3   : > { %p26_p1 = scmp.ge.s32.totalorder %s24_s12, 2  ;;  %p133_p2 = scmp.lt.s32.totalorder %s547_s11, 3 }
   0x5   : > { %s663_s12 = smov (%p26_p1, %s24_s12), 0  ;;  %p134_p3 = pnand %p475_p0, %p133_p2 }
   0x6   : > { %p164_p4 = scmp.lt.s32.totalorder (!%p134_p3), %s539_s9, 1 }
   0x7   : > { %137 = sbr.rel (%p134_p3) target bundleno = 191 (0xbf), region = 28 }
   0xc   : > { %v480_v0 = vld [vmem:[%s657_s0] ss:$0 sm:$0xff]  ;;  %v484_v1 = vld [vmem:[%s657_s0 + $0x4] ss:$0 sm:$0xff]  ;;  %v483_v2 = vld [vmem:[%s657_s0 + $0x3] ss:$0 sm:$0xff]  ;;  %v196_v18 = vlaneseq }
   0xd   : > { %190 = vbcast.lane.b32.xlu0 %v480_v0, 256  ;;  %232 = vbcast.lane.b32.xlu1 %v484_v1, 256  ;;  %v482_v3 = vld [vmem:[%s657_s0 + $0x2] ss:$0 sm:$0xff]  ;;  %v481_v4 = vld [vmem:[%s657_s0 + $0x1] ss:$0 sm:$0xff] }
   0xe   : > { %v485_v5 = vld [vmem:[%s657_s0 + $0x5] ss:$0 sm:$0xff]  ;;  %v488_v6 = vld [vmem:[%s657_s0 + $0x8] ss:$0 sm:$0xff]  ;;  %v489_v7 = vld [vmem:[%s657_s0 + $0x9] ss:$0 sm:$0xff] }
   0xf   : > { %v487_v8 = vld [vmem:[%s657_s0 + $0x7] ss:$0 sm:$0xff]  ;;  %v486_v9 = vld [vmem:[%s657_s0 + $0x6] ss:$0 sm:$0xff]  ;;  %v490_v10 = vld [vmem:[%s657_s0 + $0xa] ss:$0 sm:$0xff] }
  0x10   : > { %v491_v11 = vld [vmem:[%s657_s0 + $0xb] ss:$0 sm:$0xff]  ;;  %v494_v12 = vld [vmem:[%s657_s0 + $0xe] ss:$0 sm:$0xff]  ;;  %v495_v13 = vld [vmem:[%s657_s0 + $0xf] ss:$0 sm:$0xff] }
  0x11   : > { %224 = vbcast.lane.b32.xlu0 %v483_v2, 256  ;;  %216 = vbcast.lane.b32.xlu1 %v482_v3, 256  ;;  %v493_v14 = vld [vmem:[%s657_s0 + $0xd] ss:$0 sm:$0xff]  ;;  %v492_v15 = vld [vmem:[%s657_s0 + $0xc] ss:$0 sm:$0xff] }
  0x12   : > { %v549_v16 = vmov 839922192   ;;  %s665_s9 = smov (!%p164_p4, %s539_s9), 1  ;;  %v197_v20 = vshrl.u32 %v196_v18, 7 }
  0x13   : > { %v194_v17 = vunpack.c.l.s4 %v549_v16  ;;  %s498_s21 = sshll.u32 %s665_s9, 3 }
  0x14   : > { %s171_s24 = scalar_lea.vmem %s658_s1, %s498_s21  ;;  %s181_s27 = scalar_lea.vmem %s659_s2, %s498_s21 }
  0x15   : > { %208 = vbcast.lane.b32.xlu0 %v481_v4, 256  ;;  %259 = vbcast.lane.b32.xlu1 %v485_v5, 256  ;;  %v195_v19 = vunpack.c.0.s8 %v194_v17  ;;  %v183_v23 = vld [vmem:[%s171_s24] sm:$0xff] }
  0x17   : > { %v198_v21 = vsub.s32 %v195_v19, %v197_v20 }
  0x19   : > { %285 = vbcast.lane.b32.xlu0 %v488_v6, 256  ;;  %293 = vbcast.lane.b32.xlu1 %v489_v7, 256 }
  0x1d   : > { %277 = vbcast.lane.b32.xlu0 %v487_v8, 256  ;;  %269 = vbcast.lane.b32.xlu1 %v486_v9, 256 }
  0x21   : > { %317 = vbcast.lane.b32.xlu0 %v490_v10, 256  ;;  %327 = vbcast.lane.b32.xlu1 %v491_v11, 256 }
  0x25   : > { %353 = vbcast.lane.b32.xlu0 %v494_v12, 256  ;;  %361 = vbcast.lane.b32.xlu1 %v495_v13, 256 }
  0x29   : > { %345 = vbcast.lane.b32.xlu0 %v493_v14, 256  ;;  %337 = vbcast.lane.b32.xlu1 %v492_v15, 256 }
  0x7f   : > { %v191_v22 = vpop.permute.xlu0 %190  ;;  %v233_v25 = vpop.permute.xlu1 %232 }
  0x80   : > { %v199_v24 = vrot.slane %v191_v22, %v198_v21 }
  0x82   : > { %v201_v26 = vsub.f32 %v183_v23, %v199_v24 }
  0x83   : > { %v225_v27 = vpop.permute.xlu0 %224  ;;  %v217_v32 = vpop.permute.xlu1 %216 }
  0x84   : > { %v235_v28 = vcombine.high %v201_v26, %v201_v26  ;;  %v237_v29 = vmax.f32 %v225_v27, %v201_v26 }
  0x86   : > { %v238_v30 = vmax.f32 %v225_v27, %v235_v28  ;;  %v239_v31 = vmin.f32 %v233_v25, %v237_v29 }
  0x87   : > { %v209_v39 = vpop.permute.xlu0 %208  ;;  %v260_v42 = vpop.permute.xlu1 %259 }
  0x88   : > { %v240_v33 = vmin.f32 %v233_v25, %v238_v30  ;;  %v241_v34 = vsub.f32 %v239_v31, %v225_v27 }
  0x8a   : > { %v242_v35 = vsub.f32 %v240_v33, %v225_v27  ;;  %v243_v36 = vmul.f32 %v241_v34, %v217_v32 }
  0x8b   : > { %v286_v47 = vpop.permute.xlu0 %285  ;;  %v294_v50 = vpop.permute.xlu1 %293 }
  0x8c   : > { %v244_v37 = vmul.f32 %v242_v35, %v217_v32  ;;  %v245_v38 = vadd.f32 0.5, %v243_v36 }
  0x8e   : > { %v246_v40 = vadd.f32 0.5, %v244_v37  ;;  %v247_v41 = vfloor.f32 %v245_v38 }
  0x8f   : > { %v278_v55 = vpop.permute.xlu0 %277  ;;  %v270_v62 = vpop.permute.xlu1 %269 }
  0x90   : > { %v248_v43 = vfloor.f32 %v246_v40  ;;  %v249_v44 = vmul.f32 %v247_v41, %v209_v39 }
  0x92   : > { %v250_v45 = vmul.f32 %v248_v43, %v209_v39  ;;  %v251_v46 = vadd.f32 %v249_v44, %v225_v27 }
  0x93   : > { %v318_v1 = vpop.permute.xlu0 %317  ;;  %v328_v4 = vpop.permute.xlu1 %327 }
  0x94   : > { %v252_v48 = vadd.f32 %v250_v45, %v225_v27  ;;  %v261_v49 = vmul.f32 %v260_v42, %v251_v46 }
  0x96   : > { %v262_v51 = vmul.f32 %v260_v42, %v252_v48  ;;  %v295_v52 = vmax.f32 %v286_v47, %v261_v49 }
  0x97   : > { %v354_v9 = vpop.permute.xlu0 %353  ;;  %v362_v12 = vpop.permute.xlu1 %361 }
  0x98   : > { %v296_v53 = vmax.f32 %v286_v47, %v262_v51  ;;  %v297_v54 = vmin.f32 %v294_v50, %v295_v52 }
  0x9a   : > { %v298_v56 = vmin.f32 %v294_v50, %v296_v53  ;;  %v299_v57 = vsub.f32 %v297_v54, %v286_v47 }
  0x9b   : > { %v346_v17 = vpop.permute.xlu0 %345  ;;  %v338_v24 = vpop.permute.xlu1 %337 }
  0x9c   : > { %v300_v58 = vsub.f32 %v298_v56, %v286_v47  ;;  %v301_v59 = vmul.f32 %v299_v57, %v278_v55 }
  0x9e   : > { %v302_v60 = vmul.f32 %v300_v58, %v278_v55  ;;  %v303_v61 = vadd.f32 0.5, %v301_v59 }
  0xa0   : > { %v304_v63 = vadd.f32 0.5, %v302_v60  ;;  %v305_v0 = vfloor.f32 %v303_v61 }
  0xa2   : > { %v306_v2 = vfloor.f32 %v304_v63  ;;  %v307_v3 = vmul.f32 %v305_v0, %v270_v62 }
  0xa4   : > { %v308_v5 = vmul.f32 %v306_v2, %v270_v62  ;;  %v309_v6 = vadd.f32 %v307_v3, %v286_v47 }
  0xa6   : > { %v310_v7 = vadd.f32 %v308_v5, %v286_v47  ;;  %v319_v8 = vmul.f32 %v318_v1, %v309_v6 }
  0xa8   : > { %v320_v10 = vmul.f32 %v318_v1, %v310_v7  ;;  %v329_v11 = vadd.f32 %v328_v4, %v319_v8 }
  0xaa   : > { %v330_v13 = vadd.f32 %v328_v4, %v320_v10  ;;  %v363_v14 = vmax.f32 %v354_v9, %v329_v11 }
  0xac   : > { %v364_v15 = vmax.f32 %v354_v9, %v330_v13  ;;  %v365_v16 = vmin.f32 %v362_v12, %v363_v14 }
  0xae   : > { %v366_v18 = vmin.f32 %v362_v12, %v364_v15  ;;  %v367_v19 = vsub.f32 %v365_v16, %v354_v9 }
  0xb0   : > { %v368_v20 = vsub.f32 %v366_v18, %v354_v9  ;;  %v369_v21 = vmul.f32 %v367_v19, %v346_v17 }
  0xb2   : > { %v370_v22 = vmul.f32 %v368_v20, %v346_v17  ;;  %v371_v23 = vadd.f32 0.5, %v369_v21 }
  0xb4   : > { %v372_v25 = vadd.f32 0.5, %v370_v22  ;;  %v373_v26 = vfloor.f32 %v371_v23 }
  0xb6   : > { %v374_v27 = vfloor.f32 %v372_v25  ;;  %v375_v28 = vmul.f32 %v373_v26, %v338_v24 }
  0xb8   : > { %v376_v29 = vmul.f32 %v374_v27, %v338_v24  ;;  %v377_v30 = vadd.f32 %v375_v28, %v354_v9 }
  0xba   : > { %v378_v31 = vadd.f32 %v376_v29, %v354_v9 }
  0xbc   : > { %v381_v32 = vcombine.low %v377_v30, %v378_v31 }
  0xbe   : > { %383 = vst [vmem:[%s181_s27] sm:$0xff] %v381_v32 }
  0xbf PF: > { %s12_s11 = sadd.s32 1, %s547_s11   ;;  %s660_s9 = smov %s543_s10 }
  0xc0   : > { %p9_p5 = scmp.ge.s32.totalorder %s12_s11, 4   ;;  %s661_s10 = smov %s663_s12 }
  0xc2   :  { %11 = sbr.rel (!%p9_p5) target bundleno = 2 (0x2), region = 58 }

</bundles_post_ra>
